<compile_context>
chip_gen: v7x
topology: tpu7x:2x2x1
jax: 0.10.0
libtpu: 0.0.40
codegen_flags: <defaults>
</compile_context>

<pallas_src>
import functools

import jax
import jax.numpy as jnp
import numpy as np
from jax import lax
from jax.experimental import pallas as pl
from jax.experimental.pallas import tpu as pltpu


# ---------------------------------------------------------------------------
# Kernel
# ---------------------------------------------------------------------------
def _down_kernel(x_ref, t1_ref, bias_ref, t2_ref, pr_ref, out_ref, *, H):
    """Whole batch in one step; activations lane-packed as (N*H, W*C)."""
    dot = functools.partial(jnp.dot, preferred_element_type=jnp.float32)

    x = x_ref[...]                       # (N*H, W*Cin)
    NH = x.shape[0]
    WCm = t1_ref.shape[-1]               # W * Cmid
    WCh = t2_ref.shape[-1]               # (W//2) * Cout

    # Per-image boundary masks for the +-1 row shifts (batch folded into M, so
    # rows at image boundaries must not leak into the neighbouring image).
    # N = NH // H is a host constant -> this unrolls into a few vector compares.
    row = lax.broadcasted_iota(jnp.int32, (NH, 1), 0)
    is_first = row == 0                          # local h == 0
    is_last = row == (H - 1)                     # local h == H-1
    for n in range(1, NH // H):
        is_first = jnp.logical_or(is_first, row == n * H)
        is_last = jnp.logical_or(is_last, row == n * H + H - 1)

    def shift_up(v):
        # result[r] = v[r-1] within each image, 0 where local h == 0.
        return jnp.where(is_first, 0.0, pltpu.roll(v, shift=1, axis=0))

    def shift_dn(v):
        # result[r] = v[r+1] within each image, 0 where local h == H-1.
        # shift = NH-1 == -1 (mod NH); keeps the static shift non-negative.
        return jnp.where(is_last, 0.0, pltpu.roll(v, shift=NH - 1, axis=0))

    def conv_rows(v, taps):
        # 3x3 conv: W-direction taps + SAME W-padding are baked into the
        # banded matrices (taps[dy]); the H-direction shifts run on the XLU
        # (roll) + VPU (mask) instead of zero-FLOP matmuls.
        return (dot(shift_up(v), taps[0])
                + dot(v, taps[1])
                + dot(shift_dn(v), taps[2]))

    # conv1 + folded-BN bias + ReLU                      -> (N*H, W*Cmid)
    b1 = bias_ref[0:1, :WCm]
    h1 = jnp.maximum(conv_rows(x, (t1_ref[0], t1_ref[1], t1_ref[2])) + b1, 0.0)

    # conv2 + folded-BN bias + ReLU, with the even/odd-column half of the 2x2
    # max-pool folded into the banded weights (ReLU commutes with the 0/1
    # column gather).                                    -> (N*H, (W//2)*Cout)
    b2 = bias_ref[1:2, :WCh]
    h2_even = jnp.maximum(
        conv_rows(h1, (t2_ref[0], t2_ref[1], t2_ref[2])) + b2, 0.0)
    h2_odd = jnp.maximum(
        conv_rows(h1, (t2_ref[3], t2_ref[4], t2_ref[5])) + b2, 0.0)
    wmax = jnp.maximum(h2_even, h2_odd)

    # Row half of the 2x2 pool: even/odd row selection per image via constant
    # 0/1 matrices on the MXU, elementwise max in between.
    out_ref[...] = jnp.maximum(dot(pr_ref[0], wmax), dot(pr_ref[1], wmax))


# ---------------------------------------------------------------------------
# Host-side constant builders (one-time weight preprocessing)
# ---------------------------------------------------------------------------
def _banded_conv_weights(w_hwio, W):
    """(3,3,Ci,Co) HWIO conv weights -> (3, W*Ci, W*Co) banded matrices (one per
    dy tap) with the three dx taps and SAME zero-padding along W baked in."""
    w = np.asarray(w_hwio, dtype=np.float32)
    kh, kw, Ci, Co = w.shape
    assert kh == 3 and kw == 3
    T = np.zeros((3, W * Ci, W * Co), np.float32)
    for dy in range(3):
        for wo in range(W):
            for dx in range(3):
                wi = wo + dx - 1
                if 0 <= wi < W:
                    T[dy, wi * Ci:(wi + 1) * Ci, wo * Co:(wo + 1) * Co] = w[dy, dx]
    return T


def _banded_conv_pooled_weights(w_hwio, W):
    """Like _banded_conv_weights but with the 2x2 max-pool column selection
    (even / odd original output column) folded in.  Returns
    (6, W*Ci, (W//2)*Co): rows 0..2 = even-column taps dy=0..2, 3..5 = odd."""
    w = np.asarray(w_hwio, dtype=np.float32)
    kh, kw, Ci, Co = w.shape
    assert kh == 3 and kw == 3
    Wh = W // 2
    T = np.zeros((2, 3, W * Ci, Wh * Co), np.float32)
    for g in range(2):                       # column parity within the pool window
        for dy in range(3):
            for j in range(Wh):
                wo = 2 * j + g
                for dx in range(3):
                    wi = wo + dx - 1
                    if 0 <= wi < W:
                        T[g, dy, wi * Ci:(wi + 1) * Ci, j * Co:(j + 1) * Co] = w[dy, dx]
    return T.reshape(6, W * Ci, Wh * Co)


def _row_pool_matrices(N, H):
    """0/1 row-selection matrices for the 2x2/2 pool with batch folded into M.
    Returns (2, N*H//2, N*H): [even rows per image, odd rows per image]."""
    Hh = H // 2
    pr = np.zeros((2, N * Hh, N * H), np.float32)
    for o in range(N * Hh):
        n, r = divmod(o, Hh)
        pr[0, o, n * H + 2 * r] = 1.0
        pr[1, o, n * H + 2 * r + 1] = 1.0
    return pr


# ---------------------------------------------------------------------------
# Wrapper
# ---------------------------------------------------------------------------
def down_pallas(x_nchw, w1_hwio, b1, w2_hwio, b2):
    """x_nchw: (N, Cin, H, W) float32.  Returns (N, Cout, H//2, W//2)."""
    N, Cin, H, W = x_nchw.shape
    Cmid = w1_hwio.shape[-1]
    Cout = w2_hwio.shape[-1]
    assert H % 2 == 0 and W % 2 == 0
    Hh, Wh = H // 2, W // 2
    WCm, WCh = W * Cmid, Wh * Cout

    # One-time weight preprocessing (host): banded conv matrices (pool folded
    # into conv2), packed biases, row-pool selection matrices.
    T1 = jnp.asarray(_banded_conv_weights(w1_hwio, W))           # (3, W*Cin, W*Cmid)
    T2 = jnp.asarray(_banded_conv_pooled_weights(w2_hwio, W))    # (6, W*Cmid, Wh*Cout)
    bias = np.zeros((2, max(WCm, WCh)), np.float32)              # both biases, one buffer
    bias[0, :WCm] = np.tile(np.asarray(b1, np.float32), W)
    bias[1, :WCh] = np.tile(np.asarray(b2, np.float32), Wh)
    bias = jnp.asarray(bias)
    poolR = jnp.asarray(_row_pool_matrices(N, H))                # (2, N*Hh, N*H)

    # Layout glue (tiny): NCHW -> lane-packed (N*H, W*Cin); batch folded into
    # the matmul M dimension so the whole op is one pallas_call, no grid.
    x_packed = jnp.transpose(x_nchw, (0, 2, 3, 1)).reshape(N * H, W * Cin)
    x_packed = x_packed.astype(jnp.float32)

    out_packed = pl.pallas_call(
        functools.partial(_down_kernel, H=H),
        out_shape=jax.ShapeDtypeStruct((N * Hh, WCh), jnp.float32),
        # No grid: full arrays live in VMEM for the single step; constants are
        # DMA'd exactly once (no double-buffering of resident weights).
    )(x_packed, T1, bias, T2, poolR)

    # Layout glue back to PyTorch NCHW.
    out = out_packed.reshape(N, Hh, Wh, Cout)
    return jnp.transpose(out, (0, 3, 1, 2))


# ---------------------------------------------------------------------------
# BN folding + plain-JAX reference
# ---------------------------------------------------------------------------
def fold_bn(w_oihw, b, gamma, beta, mean, var, eps=1e-5):
    """Fold eval-mode BatchNorm2d into conv weight (OIHW) and bias."""
    scale = gamma / jnp.sqrt(var + eps)
    w_fold = w_oihw * scale[:, None, None, None]
    b_fold = (b - mean) * scale + beta
    return w_fold, b_fold


def ref_forward(x_nchw, w1_oihw, b1, w2_oihw, b2):
    """Plain-JAX reference (same folded params) for verification."""
    dn = ("NCHW", "OIHW", "NCHW")
    h = lax.conv_general_dilated(x_nchw, w1_oihw, (1, 1), "SAME",
                                 dimension_numbers=dn)
    h = jax.nn.relu(h + b1[None, :, None, None])
    h = lax.conv_general_dilated(h, w2_oihw, (1, 1), "SAME",
                                 dimension_numbers=dn)
    h = jax.nn.relu(h + b2[None, :, None, None])
    return lax.reduce_window(h, -jnp.inf, lax.max,
                             (1, 1, 2, 2), (1, 1, 2, 2), "VALID")


if __name__ == "__main__":
    # Down(in_channels=4, out_channels=8); DoubleConv uses mid_channels=out_channels=8.
    N, Cin, H, W = 2, 4, 16, 16
    Cmid = Cout = 8

    key = jax.random.PRNGKey(0)
    keys = jax.random.split(key, 13)

    x = jax.random.normal(keys[0], (N, Cin, H, W), jnp.float32)

    # conv1 params (PyTorch layout OIHW) + BatchNorm2d(Cmid) params (eval mode)
    w1 = jax.random.normal(keys[1], (Cmid, Cin, 3, 3), jnp.float32) * 0.1
    b1 = jax.random.normal(keys[2], (Cmid,), jnp.float32) * 0.1
    g1 = jax.random.uniform(keys[3], (Cmid,), jnp.float32, 0.5, 1.5)
    be1 = jax.random.normal(keys[4], (Cmid,), jnp.float32) * 0.1
    m1 = jax.random.normal(keys[5], (Cmid,), jnp.float32) * 0.1
    v1 = jax.random.uniform(keys[6], (Cmid,), jnp.float32, 0.5, 1.5)

    # conv2 params + BatchNorm2d(Cout) params (non-trivial running stats so the
    # BN2 folding path is actually exercised).
    w2 = jax.random.normal(keys[7], (Cout, Cmid, 3, 3), jnp.float32) * 0.1
    b2 = jax.random.normal(keys[8], (Cout,), jnp.float32) * 0.1
    g2 = jax.random.uniform(keys[9], (Cout,), jnp.float32, 0.5, 1.5)
    be2 = jax.random.normal(keys[10], (Cout,), jnp.float32) * 0.1
    m2 = jax.random.normal(keys[11], (Cout,), jnp.float32) * 0.1
    v2 = jax.random.uniform(keys[12], (Cout,), jnp.float32, 0.5, 1.5)

    # Fold eval-mode BN into the convs (host-side glue).
    # TODO(synk): train-mode BatchNorm (batch statistics) is not implemented.
    w1f, b1f = fold_bn(w1, b1, g1, be1, m1, v1)
    w2f, b2f = fold_bn(w2, b2, g2, be2, m2, v2)

    # OIHW -> HWIO for the lane-packed kernel weights
    w1_hwio = jnp.transpose(w1f, (2, 3, 1, 0))
    w2_hwio = jnp.transpose(w2f, (2, 3, 1, 0))

    out = down_pallas(x, w1_hwio, b1f, w2_hwio, b2f)
    out = jax.block_until_ready(out)

    ref = jax.block_until_ready(ref_forward(x, w1f, b1f, w2f, b2f))
    assert out.shape == (N, Cout, H // 2, W // 2), out.shape
    np.testing.assert_allclose(np.asarray(out), np.asarray(ref),
                               rtol=1e-4, atol=1e-4)

    print("KERNEL_OK")
</pallas_src>

<mosaic_0001>
module attributes {stable_mosaic.version = 11 : i64} {
  func.func @_down_kernel(%arg0: memref<32x64xf32, #tpu.memory_space<vmem>>, %arg1: memref<3x64x128xf32, #tpu.memory_space<vmem>>, %arg2: memref<2x128xf32, #tpu.memory_space<vmem>>, %arg3: memref<6x128x64xf32, #tpu.memory_space<vmem>>, %arg4: memref<2x16x32xf32, #tpu.memory_space<vmem>>, %arg5: memref<16x64xf32, #tpu.memory_space<vmem>>) attributes {dimension_semantics = [], scalar_prefetch = 0 : i64, scratch_operands = 0 : i64, tpu.core_type = #tpu.core_type<tc>} {
    %c0 = arith.constant 0 : index
    %c0_0 = arith.constant 0 : index
    %0 = vector.load %arg0[%c0, %c0_0] : memref<32x64xf32, #tpu.memory_space<vmem>>, vector<32x64xf32>
    %1 = tpu.iota {dimensions = array<i32: 0>} : vector<32x1xi32>
    %c0_i32 = arith.constant 0 : i32
    %2 = vector.broadcast %c0_i32 : i32 to vector<32x1xi32>
    %3 = arith.cmpi eq, %1, %2 : vector<32x1xi32>
    %c15_i32 = arith.constant 15 : i32
    %4 = vector.broadcast %c15_i32 : i32 to vector<32x1xi32>
    %5 = arith.cmpi eq, %1, %4 : vector<32x1xi32>
    %c16_i32 = arith.constant 16 : i32
    %6 = vector.broadcast %c16_i32 : i32 to vector<32x1xi32>
    %7 = arith.cmpi eq, %1, %6 : vector<32x1xi32>
    %8 = arith.ori %3, %7 : vector<32x1xi1>
    %c31_i32 = arith.constant 31 : i32
    %9 = vector.broadcast %c31_i32 : i32 to vector<32x1xi32>
    %10 = arith.cmpi eq, %1, %9 : vector<32x1xi32>
    %11 = arith.ori %5, %10 : vector<32x1xi1>
    %c0_1 = arith.constant 0 : index
    %c0_2 = arith.constant 0 : index
    %12 = vector.load %arg2[%c0_1, %c0_2] : memref<2x128xf32, #tpu.memory_space<vmem>>, vector<1x128xf32>
    %c0_3 = arith.constant 0 : index
    %c0_4 = arith.constant 0 : index
    %c0_5 = arith.constant 0 : index
    %13 = vector.load %arg1[%c0_3, %c0_4, %c0_5] : memref<3x64x128xf32, #tpu.memory_space<vmem>>, vector<1x64x128xf32>
    %14 = vector.shape_cast %13 : vector<1x64x128xf32> to vector<64x128xf32>
    %c1 = arith.constant 1 : index
    %c0_6 = arith.constant 0 : index
    %c0_7 = arith.constant 0 : index
    %15 = vector.load %arg1[%c1, %c0_6, %c0_7] : memref<3x64x128xf32, #tpu.memory_space<vmem>>, vector<1x64x128xf32>
    %16 = vector.shape_cast %15 : vector<1x64x128xf32> to vector<64x128xf32>
    %c2 = arith.constant 2 : index
    %c0_8 = arith.constant 0 : index
    %c0_9 = arith.constant 0 : index
    %17 = vector.load %arg1[%c2, %c0_8, %c0_9] : memref<3x64x128xf32, #tpu.memory_space<vmem>>, vector<1x64x128xf32>
    %18 = vector.shape_cast %17 : vector<1x64x128xf32> to vector<64x128xf32>
    %c1_i32 = arith.constant 1 : i32
    %19 = tpu.dynamic_rotate %0 by %c1_i32 dim 0 : vector<32x64xf32>, i32 -> vector<32x64xf32>
    %cst = arith.constant 0.000000e+00 : f32
    %20 = vector.shape_cast %8 : vector<32x1xi1> to vector<32x1xi1>
    %21 = vector.broadcast %20 : vector<32x1xi1> to vector<32x64xi1>
    %22 = vector.broadcast %cst : f32 to vector<32x64xf32>
    %23 = arith.select %21, %22, %19 : vector<32x64xi1>, vector<32x64xf32>
    %cst_10 = arith.constant dense<0.000000e+00> : vector<32x128xf32>
    %24 = tpu.matmul %23, %14, %cst_10 {dimension_numbers = #tpu.dot_dimension_numbers<[1], [0], [0], [1], [0, 0, 1, 1], [], []>} : vector<32x64xf32>, vector<64x128xf32>, vector<32x128xf32> -> vector<32x128xf32>
    %cst_11 = arith.constant dense<0.000000e+00> : vector<32x128xf32>
    %25 = tpu.matmul %0, %16, %cst_11 {dimension_numbers = #tpu.dot_dimension_numbers<[1], [0], [0], [1], [0, 0, 1, 1], [], []>} : vector<32x64xf32>, vector<64x128xf32>, vector<32x128xf32> -> vector<32x128xf32>
    %26 = arith.addf %24, %25 : vector<32x128xf32>
    %c31_i32_12 = arith.constant 31 : i32
    %27 = tpu.dynamic_rotate %0 by %c31_i32_12 dim 0 : vector<32x64xf32>, i32 -> vector<32x64xf32>
    %cst_13 = arith.constant 0.000000e+00 : f32
    %28 = vector.shape_cast %11 : vector<32x1xi1> to vector<32x1xi1>
    %29 = vector.broadcast %28 : vector<32x1xi1> to vector<32x64xi1>
    %30 = vector.broadcast %cst_13 : f32 to vector<32x64xf32>
    %31 = arith.select %29, %30, %27 : vector<32x64xi1>, vector<32x64xf32>
    %cst_14 = arith.constant dense<0.000000e+00> : vector<32x128xf32>
    %32 = tpu.matmul %31, %18, %cst_14 {dimension_numbers = #tpu.dot_dimension_numbers<[1], [0], [0], [1], [0, 0, 1, 1], [], []>} : vector<32x64xf32>, vector<64x128xf32>, vector<32x128xf32> -> vector<32x128xf32>
    %33 = arith.addf %26, %32 : vector<32x128xf32>
    %34 = vector.broadcast %12 : vector<1x128xf32> to vector<32x128xf32>
    %35 = arith.addf %33, %34 : vector<32x128xf32>
    %cst_15 = arith.constant 0.000000e+00 : f32
    %36 = vector.broadcast %cst_15 : f32 to vector<32x128xf32>
    %37 = arith.maximumf %35, %36 : vector<32x128xf32>
    %c1_16 = arith.constant 1 : index
    %c0_17 = arith.constant 0 : index
    %38 = vector.load %arg2[%c1_16, %c0_17] : memref<2x128xf32, #tpu.memory_space<vmem>>, vector<1x64xf32>
    %c0_18 = arith.constant 0 : index
    %c0_19 = arith.constant 0 : index
    %c0_20 = arith.constant 0 : index
    %39 = vector.load %arg3[%c0_18, %c0_19, %c0_20] : memref<6x128x64xf32, #tpu.memory_space<vmem>>, vector<1x128x64xf32>
    %40 = vector.shape_cast %39 : vector<1x128x64xf32> to vector<128x64xf32>
    %c1_21 = arith.constant 1 : index
    %c0_22 = arith.constant 0 : index
    %c0_23 = arith.constant 0 : index
    %41 = vector.load %arg3[%c1_21, %c0_22, %c0_23] : memref<6x128x64xf32, #tpu.memory_space<vmem>>, vector<1x128x64xf32>
    %42 = vector.shape_cast %41 : vector<1x128x64xf32> to vector<128x64xf32>
    %c2_24 = arith.constant 2 : index
    %c0_25 = arith.constant 0 : index
    %c0_26 = arith.constant 0 : index
    %43 = vector.load %arg3[%c2_24, %c0_25, %c0_26] : memref<6x128x64xf32, #tpu.memory_space<vmem>>, vector<1x128x64xf32>
    %44 = vector.shape_cast %43 : vector<1x128x64xf32> to vector<128x64xf32>
    %c1_i32_27 = arith.constant 1 : i32
    %45 = tpu.dynamic_rotate %37 by %c1_i32_27 dim 0 : vector<32x128xf32>, i32 -> vector<32x128xf32>
    %cst_28 = arith.constant 0.000000e+00 : f32
    %46 = vector.shape_cast %8 : vector<32x1xi1> to vector<32x1xi1>
    %47 = vector.broadcast %46 : vector<32x1xi1> to vector<32x128xi1>
    %48 = vector.broadcast %cst_28 : f32 to vector<32x128xf32>
    %49 = arith.select %47, %48, %45 : vector<32x128xi1>, vector<32x128xf32>
    %cst_29 = arith.constant dense<0.000000e+00> : vector<32x64xf32>
    %50 = tpu.matmul %49, %40, %cst_29 {dimension_numbers = #tpu.dot_dimension_numbers<[1], [0], [0], [1], [0, 0, 1, 1], [], []>} : vector<32x128xf32>, vector<128x64xf32>, vector<32x64xf32> -> vector<32x64xf32>
    %cst_30 = arith.constant dense<0.000000e+00> : vector<32x64xf32>
    %51 = tpu.matmul %37, %42, %cst_30 {dimension_numbers = #tpu.dot_dimension_numbers<[1], [0], [0], [1], [0, 0, 1, 1], [], []>} : vector<32x128xf32>, vector<128x64xf32>, vector<32x64xf32> -> vector<32x64xf32>
    %52 = arith.addf %50, %51 : vector<32x64xf32>
    %c31_i32_31 = arith.constant 31 : i32
    %53 = tpu.dynamic_rotate %37 by %c31_i32_31 dim 0 : vector<32x128xf32>, i32 -> vector<32x128xf32>
    %cst_32 = arith.constant 0.000000e+00 : f32
    %54 = vector.shape_cast %11 : vector<32x1xi1> to vector<32x1xi1>
    %55 = vector.broadcast %54 : vector<32x1xi1> to vector<32x128xi1>
    %56 = vector.broadcast %cst_32 : f32 to vector<32x128xf32>
    %57 = arith.select %55, %56, %53 : vector<32x128xi1>, vector<32x128xf32>
    %cst_33 = arith.constant dense<0.000000e+00> : vector<32x64xf32>
    %58 = tpu.matmul %57, %44, %cst_33 {dimension_numbers = #tpu.dot_dimension_numbers<[1], [0], [0], [1], [0, 0, 1, 1], [], []>} : vector<32x128xf32>, vector<128x64xf32>, vector<32x64xf32> -> vector<32x64xf32>
    %59 = arith.addf %52, %58 : vector<32x64xf32>
    %60 = vector.broadcast %38 : vector<1x64xf32> to vector<32x64xf32>
    %61 = arith.addf %59, %60 : vector<32x64xf32>
    %cst_34 = arith.constant 0.000000e+00 : f32
    %62 = vector.broadcast %cst_34 : f32 to vector<32x64xf32>
    %63 = arith.maximumf %61, %62 : vector<32x64xf32>
    %c3 = arith.constant 3 : index
    %c0_35 = arith.constant 0 : index
    %c0_36 = arith.constant 0 : index
    %64 = vector.load %arg3[%c3, %c0_35, %c0_36] : memref<6x128x64xf32, #tpu.memory_space<vmem>>, vector<1x128x64xf32>
    %65 = vector.shape_cast %64 : vector<1x128x64xf32> to vector<128x64xf32>
    %c4 = arith.constant 4 : index
    %c0_37 = arith.constant 0 : index
    %c0_38 = arith.constant 0 : index
    %66 = vector.load %arg3[%c4, %c0_37, %c0_38] : memref<6x128x64xf32, #tpu.memory_space<vmem>>, vector<1x128x64xf32>
    %67 = vector.shape_cast %66 : vector<1x128x64xf32> to vector<128x64xf32>
    %c5 = arith.constant 5 : index
    %c0_39 = arith.constant 0 : index
    %c0_40 = arith.constant 0 : index
    %68 = vector.load %arg3[%c5, %c0_39, %c0_40] : memref<6x128x64xf32, #tpu.memory_space<vmem>>, vector<1x128x64xf32>
    %69 = vector.shape_cast %68 : vector<1x128x64xf32> to vector<128x64xf32>
    %c1_i32_41 = arith.constant 1 : i32
    %70 = tpu.dynamic_rotate %37 by %c1_i32_41 dim 0 : vector<32x128xf32>, i32 -> vector<32x128xf32>
    %cst_42 = arith.constant 0.000000e+00 : f32
    %71 = vector.shape_cast %8 : vector<32x1xi1> to vector<32x1xi1>
    %72 = vector.broadcast %71 : vector<32x1xi1> to vector<32x128xi1>
    %73 = vector.broadcast %cst_42 : f32 to vector<32x128xf32>
    %74 = arith.select %72, %73, %70 : vector<32x128xi1>, vector<32x128xf32>
    %cst_43 = arith.constant dense<0.000000e+00> : vector<32x64xf32>
    %75 = tpu.matmul %74, %65, %cst_43 {dimension_numbers = #tpu.dot_dimension_numbers<[1], [0], [0], [1], [0, 0, 1, 1], [], []>} : vector<32x128xf32>, vector<128x64xf32>, vector<32x64xf32> -> vector<32x64xf32>
    %cst_44 = arith.constant dense<0.000000e+00> : vector<32x64xf32>
    %76 = tpu.matmul %37, %67, %cst_44 {dimension_numbers = #tpu.dot_dimension_numbers<[1], [0], [0], [1], [0, 0, 1, 1], [], []>} : vector<32x128xf32>, vector<128x64xf32>, vector<32x64xf32> -> vector<32x64xf32>
    %77 = arith.addf %75, %76 : vector<32x64xf32>
    %c31_i32_45 = arith.constant 31 : i32
    %78 = tpu.dynamic_rotate %37 by %c31_i32_45 dim 0 : vector<32x128xf32>, i32 -> vector<32x128xf32>
    %cst_46 = arith.constant 0.000000e+00 : f32
    %79 = vector.shape_cast %11 : vector<32x1xi1> to vector<32x1xi1>
    %80 = vector.broadcast %79 : vector<32x1xi1> to vector<32x128xi1>
    %81 = vector.broadcast %cst_46 : f32 to vector<32x128xf32>
    %82 = arith.select %80, %81, %78 : vector<32x128xi1>, vector<32x128xf32>
    %cst_47 = arith.constant dense<0.000000e+00> : vector<32x64xf32>
    %83 = tpu.matmul %82, %69, %cst_47 {dimension_numbers = #tpu.dot_dimension_numbers<[1], [0], [0], [1], [0, 0, 1, 1], [], []>} : vector<32x128xf32>, vector<128x64xf32>, vector<32x64xf32> -> vector<32x64xf32>
    %84 = arith.addf %77, %83 : vector<32x64xf32>
    %85 = vector.broadcast %38 : vector<1x64xf32> to vector<32x64xf32>
    %86 = arith.addf %84, %85 : vector<32x64xf32>
    %cst_48 = arith.constant 0.000000e+00 : f32
    %87 = vector.broadcast %cst_48 : f32 to vector<32x64xf32>
    %88 = arith.maximumf %86, %87 : vector<32x64xf32>
    %89 = arith.maximumf %63, %88 : vector<32x64xf32>
    %c0_49 = arith.constant 0 : index
    %c0_50 = arith.constant 0 : index
    %c0_51 = arith.constant 0 : index
    %90 = vector.load %arg4[%c0_49, %c0_50, %c0_51] : memref<2x16x32xf32, #tpu.memory_space<vmem>>, vector<1x16x32xf32>
    %91 = vector.shape_cast %90 : vector<1x16x32xf32> to vector<16x32xf32>
    %cst_52 = arith.constant dense<0.000000e+00> : vector<16x64xf32>
    %92 = tpu.matmul %91, %89, %cst_52 {dimension_numbers = #tpu.dot_dimension_numbers<[1], [0], [0], [1], [0, 0, 1, 1], [], []>} : vector<16x32xf32>, vector<32x64xf32>, vector<16x64xf32> -> vector<16x64xf32>
    %c1_53 = arith.constant 1 : index
    %c0_54 = arith.constant 0 : index
    %c0_55 = arith.constant 0 : index
    %93 = vector.load %arg4[%c1_53, %c0_54, %c0_55] : memref<2x16x32xf32, #tpu.memory_space<vmem>>, vector<1x16x32xf32>
    %94 = vector.shape_cast %93 : vector<1x16x32xf32> to vector<16x32xf32>
    %cst_56 = arith.constant dense<0.000000e+00> : vector<16x64xf32>
    %95 = tpu.matmul %94, %89, %cst_56 {dimension_numbers = #tpu.dot_dimension_numbers<[1], [0], [0], [1], [0, 0, 1, 1], [], []>} : vector<16x32xf32>, vector<32x64xf32>, vector<16x64xf32> -> vector<16x64xf32>
    %96 = arith.maximumf %92, %95 : vector<16x64xf32>
    %c0_57 = arith.constant 0 : index
    %c0_58 = arith.constant 0 : index
    %97 = vector.load %arg5[%c0_57, %c0_58] : memref<16x64xf32, #tpu.memory_space<vmem>>, vector<16x64xf32>
    tpu.vector_store %arg5[%c0_57, %c0_58], %96 {strides = array<i32>} : memref<16x64xf32, #tpu.memory_space<vmem>>, vector<16x64xf32>,
    return
  }
}

</mosaic_0001>

<bundles_post_ra>
// kernel: tpu_custom_call.1
= control target key start
LH: loop header
LB: loop body
LE: loop exit
PB: predicated region body
PF: predicated region fallthrough
CT: control target
= control target key end

     0   :  { %v25_v3 = vlaneseq  ;;  %vm102_vm0 = vcmask 523264   ;;  %s2788_s0 = inlined_call_operand.vmem [shape: f32[32,64], index: 0, kind: input, shape index: {}]   ;;  %s2789_s1 = inlined_call_operand.vmem [shape: f32[3,64,128], index: 1, kind: input, shape index: {}]   ;;  %s2790_s2 = inlined_call_operand.vmem [shape: f32[2,128], index: 2, kind: input, shape index: {}]   ;;  %s2791_s3 = inlined_call_operand.vmem [shape: f32[6,128,64], index: 3, kind: input, shape index: {}]   ;;  %s2792_s4 = inlined_call_operand.vmem [shape: f32[2,16,32], index: 4, kind: input, shape index: {}]   ;;  %s2793_s5 = inlined_call_operand.hbm [shape: f32[16,64], index: 5, kind: output, shape index: {}]  }
   0x1   :  { %v55_v0 = vld [vmem:[%s2789_s1] sm:$0xff]  ;;  %v56_v1 = vld [vmem:[%s2789_s1 + $0x8] sm:$0xff]  ;;  %v57_v2 = vld [vmem:[%s2789_s1 + $0x10] sm:$0xff] }
   0x2   :  { %v1919_v4 = vpack.c.bf16 %v56_v1, %v55_v0  ;;  %v58_v5 = vld [vmem:[%s2789_s1 + $0x18] sm:$0xff]  ;;  %v59_v7 = vld [vmem:[%s2789_s1 + $0x20] sm:$0xff]  ;;  %v60_v8 = vld [vmem:[%s2789_s1 + $0x28] sm:$0xff]  ;;  %v2264_v10 = vshrl.u32 %v25_v3, 7 }
   0x3   :  { %v1923_v6 = vpack.c.bf16 %v58_v5, %v57_v2  ;;  %v1287_v9 = vld [vmem:[%s2789_s1 + $0x40] sm:$0xff]  ;;  %v1288_v11 = vld [vmem:[%s2789_s1 + $0x48] sm:$0xff]  ;;  %v2277_v13 = vld [vmem:[%s2788_s0 + $0x18] sm:$0xff]  ;;  %v1927_v17 = vpack.c.bf16 %v60_v8, %v59_v7 }
   0x4   :  { %1920 = vmatprep.subr.bf16.mxu0 %v1919_v4  ;;  %v2272_v12 = vld [vmem:[%s2788_s0] sm:$0xff]  ;;  %v1903_v14 = vpack.c.bf16 %v1288_v11, %v1287_v9  ;;  %vm30_vm1 = vcmp.eq.s32.totalorder %v2264_v10, 0  ;;  %v84_v16 = vrot.slane %v2277_v13, 7  ;;  %vm85_vm2 = vcmp.lt.s32.totalorder %v2264_v10, 1  ;;  %v1289_v18 = vld [vmem:[%s2789_s1 + $0x50] sm:$0xff]  ;;  %v1290_v19 = vld [vmem:[%s2789_s1 + $0x58] sm:$0xff] }
   0x5   :  { %1922 = vmatpush3.bf16.msra.mxu0 %v1919_v4  ;;  %v81_v15 = vrot.slane %v2272_v12, 7  ;;  %1603 = vmatprep.mubr.msk.f32.mxu1 %vm102_vm0, %v2272_v12  ;;  %v61_v20 = vld [vmem:[%s2789_s1 + $0x30] sm:$0xff]  ;;  %v62_v21 = vld [vmem:[%s2789_s1 + $0x38] sm:$0xff]  ;;  %v1907_v23 = vpack.c.bf16 %v1290_v19, %v1289_v18  ;;  %v1291_v24 = vld [vmem:[%s2789_s1 + $0x60] sm:$0xff]  ;;  %v2333_v35 = vadd.s32 16, %v2264_v10  ;;  %v297_v46 = vrot.slane %v2272_v12, 1 }
   0x6   :  { %1924 = vmatprep.subr.bf16.mxu0 %v1923_v6  ;;  %1904 = vmatprep.subr.bf16.mxu1 %v1903_v14  ;;  %v1292_v26 = vld [vmem:[%s2789_s1 + $0x68] sm:$0xff]  ;;  %v2313_v28 = vld [vmem:[%s2788_s0 + $0x10] sm:$0xff]  ;;  %v1931_v29 = vpack.c.bf16 %v62_v21, %v61_v20  ;;  %v1294_v32 = vld [vmem:[%s2789_s1 + $0x78] sm:$0xff] }
   0x7   :  { %v89_v22 = vsel %vm85_vm2, %v84_v16, %v81_v15  ;;  %1906 = vmatpush3.bf16.msra.mxu1 %v1903_v14  ;;  %v1911_v27 = vpack.c.bf16 %v1292_v26, %v1291_v24  ;;  %v2318_v30 = vld [vmem:[%s2788_s0 + $0x8] sm:$0xff]  ;;  %v1293_v31 = vld [vmem:[%s2789_s1 + $0x70] sm:$0xff]  ;;  %v1295_v33 = vld [vmem:[%s2789_s1 + $0x80] sm:$0xff]  ;;  %v83_v36 = vrot.slane %v2313_v28, 7  ;;  %vm40_vm3 = vcmp.eq.s32.totalorder %v2333_v35, 16 }
   0x8   :  { %v98_v25 = vsel %vm30_vm1, 0.0, %v89_v22  ;;  %1908 = vmatprep.subr.bf16.mxu1 %v1907_v23  ;;  %v1296_v34 = vld [vmem:[%s2789_s1 + $0x88] sm:$0xff]  ;;  %v82_v37 = vrot.slane %v2318_v30, 7  ;;  %v1915_v38 = vpack.c.bf16 %v1294_v32, %v1293_v31  ;;  %v1297_v40 = vld [vmem:[%s2789_s1 + $0x90] sm:$0xff]  ;;  %v1298_v41 = vld [vmem:[%s2789_s1 + $0x98] sm:$0xff]  ;;  %v298_v49 = vrot.slane %v2318_v30, 1 }
   0x9   :  { %1926 = vmatpush3.bf16.msra.mxu0 %v1923_v6  ;;  %1625 = vmatprep.mubr.msk.f32.mxu0 %vm102_vm0, %v98_v25  ;;  %v1935_v39 = vpack.c.bf16 %v1296_v34, %v1295_v33  ;;  %v1316_v43 = vld [vmem:[%s2791_s3 + $0x80] sm:$0xff]  ;;  %v1317_v44 = vld [vmem:[%s2791_s3 + $0x88] sm:$0xff]  ;;  %v1939_v47 = vpack.c.bf16 %v1298_v41, %v1297_v40 }
   0xa   :  { %1928 = vmatprep.subr.bf16.mxu0 %v1927_v17  ;;  %v87_v42 = vsel %vm85_vm2, %v82_v37, %v83_v36  ;;  %v88_v45 = vsel %vm85_vm2, %v81_v15, %v82_v37  ;;  %v1951_v50 = vpack.c.bf16 %v1317_v44, %v1316_v43 }
   0xb   :  { %1910 = vmatpush3.bf16.msra.mxu1 %v1907_v23  ;;  %v100_v48 = vsel %vm40_vm3, 0.0, %v87_v42 }
   0xc   :  { %1912 = vmatprep.subr.bf16.mxu1 %v1911_v27 }
   0xd   :  { %1930 = vmatpush3.bf16.msra.mxu0 %v1927_v17 }
   0xe   :  { %1932 = vmatprep.subr.bf16.mxu0 %v1931_v29 }
   0xf   :  { %1914 = vmatpush3.bf16.msra.mxu1 %v1911_v27 }
  0x10   :  { %1916 = vmatprep.subr.bf16.mxu1 %v1915_v38 }
  0x11   :  { %1934 = vmatpush3.bf16.msra.mxu0 %v1931_v29 }
  0x12   :  { %1936 = vmatprep.subr.bf16.mxu0 %v1935_v39 }
  0x13   :  { %10 = vsyncpa [#allocation3], 0  ;;  %v1299_v51 = vld [vmem:[%s2789_s1 + $0xa0] sm:$0xff]  ;;  %v1300_v52 = vld [vmem:[%s2789_s1 + $0xa8] sm:$0xff]  ;;  %vm301_vm4 = vcmp.lt.s32.totalorder %v2264_v10, 7  ;;  %1918 = vmatpush3.bf16.msra.mxu1 %v1915_v38  ;;  %v86_v55 = vsel %vm85_vm2, %v83_v36, %v84_v16  ;;  %v2398_v63 = vadd.s32 8, %v2264_v10 }
  0x14   :  { %1626 = vmatmul.mubr.msk.f32.vlgmr.msra.gmra.mrb[0].mxu0 %vm102_vm0, %v88_v45  ;;  %v1318_v53 = vld [vmem:[%s2791_s3 + $0x90] sm:$0xff]  ;;  %v1319_v54 = vld [vmem:[%s2791_s3 + $0x98] sm:$0xff]  ;;  %v1943_v56 = vpack.c.bf16 %v1300_v52, %v1299_v51  ;;  %v304_v57 = vsel %vm301_vm4, %v297_v46, %v298_v49  ;;  %1952 = vmatprep.subr.bf16.mxu1 %v1951_v50  ;;  %v1320_v61 = vld [vmem:[%s2791_s3 + $0xa0] sm:$0xff]  ;;  %v299_v0 = vrot.slane %v2313_v28, 1  ;;  %v300_v8 = vrot.slane %v2277_v13, 1  ;;  %s2210_s10 = smov [#allocation2]  }
  0x15   :  { %1938 = vmatpush3.bf16.msra.mxu0 %v1935_v39  ;;  %1628 = vmatprep.mubr.msk.f32.mxu0 %vm102_vm0, %v100_v48  ;;  %v1301_v58 = vld [vmem:[%s2789_s1 + $0xb0] sm:$0xff]  ;;  %v1302_v59 = vld [vmem:[%s2789_s1 + $0xb8] sm:$0xff]  ;;  %v1955_v60 = vpack.c.bf16 %v1319_v54, %v1318_v53  ;;  %v1321_v62 = vld [vmem:[%s2791_s3 + $0xa8] sm:$0xff]  ;;  %vm35_vm5 = vcmp.eq.s32.totalorder %v2398_v63, 15  ;;  %v2420_v9 = vadd.s32 24, %v2264_v10  ;;  %vm1101_vm11 = vcmask 261120  }
  0x16   :  { %1940 = vmatprep.subr.bf16.mxu0 %v1939_v47  ;;  %1604 = vmatmul.mubr.msk.f32.vlgmr.msra.gmra.mrb[0].mxu1 %vm102_vm0, %v2318_v30  ;;  %v1947_v1 = vpack.c.bf16 %v1302_v59, %v1301_v58  ;;  %v1373_v2 = vld [vmem:[%s2791_s3 + $0x200] sm:$0xff]  ;;  %v1374_v3 = vld [vmem:[%s2791_s3 + $0x208] sm:$0xff]  ;;  %v1959_v4 = vpack.c.bf16 %v1321_v62, %v1320_v61  ;;  %v1322_v5 = vld [vmem:[%s2791_s3 + $0xb0] sm:$0xff]  ;;  %v303_v7 = vsel %vm301_vm4, %v298_v49, %v299_v0  ;;  %s1276_s11 = sshll.u32 %s2210_s10, 4  ;;  %s1277_s11 = int_to_ptr.vmem [resolvable:$true] %s1276_s11 }
  0x17   :  { %1606 = vmatprep.mubr.msk.f32.mxu1 %vm102_vm0, %v2313_v28  ;;  %1954 = vmatpush3.bf16.msra.mxu1 %v1951_v50  ;;  %v1323_v6 = vld [vmem:[%s2791_s3 + $0xb8] sm:$0xff]  ;;  %v2047_v11 = vpack.c.bf16 %v1374_v3, %v1373_v2  ;;  %v1375_v12 = vld [vmem:[%s2791_s3 + $0x210] sm:$0xff]  ;;  %v1324_v16 = vld [vmem:[%s2791_s3 + $0xc0] sm:$0xff]  ;;  %v315_v17 = vsel %vm35_vm5, 0.0, %v303_v7  ;;  %v302_v18 = vsel %vm301_vm4, %v299_v0, %v300_v8  ;;  %vm49_vm6 = vcmp.eq.s32.totalorder %v2420_v9, 31  ;;  %s2186_s0 = scalar_lea.vmem %s1277_s11, 256  ;;  %p2191_p1 = scmp.lt.s32.totalorder %s1277_s11, %s1277_s11 }
  0x18   :  { %1629 = vmatmul.mubr.msk.f32.gmra.mrb[2].mxu0 %vm102_vm0, %v86_v55  ;;  %1956 = vmatprep.subr.bf16.mxu1 %v1955_v60  ;;  %v1376_v14 = vld [vmem:[%s2791_s3 + $0x218] sm:$0xff]  ;;  %v1963_v15 = vpack.c.bf16 %v1323_v6, %v1322_v5  ;;  %v305_v19 = vsel %vm301_vm4, %v300_v8, %v297_v46  ;;  %v1377_v21 = vld [vmem:[%s2791_s3 + $0x220] sm:$0xff]  ;;  %v1378_v22 = vld [vmem:[%s2791_s3 + $0x228] sm:$0xff]  ;;  %p2187_p0 = scmp.ne.s32.totalorder %s1277_s11, %s2186_s0  ;;  %p2192_p2 = scmp.lt.s32.totalorder %s2186_s0, %s2186_s0 }
  0x19   :  { %1942 = vmatpush3.bf16.msra.mxu0 %v1939_v47  ;;  %1647 = vmatprep.mubr.msk.f32.mxu0 %vm102_vm0, %v304_v57  ;;  %v2051_v20 = vpack.c.bf16 %v1376_v14, %v1375_v12  ;;  %v1326_v24 = vld [vmem:[%s2791_s3 + $0xd0] sm:$0xff]  ;;  %v1327_v25 = vld [vmem:[%s2791_s3 + $0xd8] sm:$0xff]  ;;  %v317_v26 = vsel %vm49_vm6, 0.0, %v305_v19  ;;  %v2055_v27 = vpack.c.bf16 %v1378_v22, %v1377_v21  ;;  %v1381_v32 = vld [vmem:[%s2791_s3 + $0x240] sm:$0xff] }
  0x1a   :  { %1944 = vmatprep.subr.bf16.mxu0 %v1943_v56  ;;  %1607 = vmatmul.mubr.msk.f32.gmra.mrb[2].mxu1 %vm102_vm0, %v2277_v13  ;;  %v1325_v13 = vld [vmem:[%s2791_s3 + $0xc8] sm:$0xff]  ;;  %v1379_v28 = vld [vmem:[%s2791_s3 + $0x230] sm:$0xff]  ;;  %v1380_v29 = vld [vmem:[%s2791_s3 + $0x238] sm:$0xff]  ;;  %v1971_v30 = vpack.c.bf16 %v1327_v25, %v1326_v24  ;;  %p2193_p3 = por %p2192_p2, %p2191_p1 }
  0x1b   :  { %1958 = vmatpush3.bf16.msra.mxu1 %v1955_v60  ;;  %v1967_v23 = vpack.c.bf16 %v1325_v13, %v1324_v16  ;;  %v2059_v31 = vpack.c.bf16 %v1380_v29, %v1379_v28  ;;  %v1382_v33 = vld [vmem:[%s2791_s3 + $0x248] sm:$0xff]  ;;  %v1383_v36 = vld [vmem:[%s2791_s3 + $0x250] sm:$0xff]  ;;  %v1384_v37 = vld [vmem:[%s2791_s3 + $0x258] sm:$0xff] }
  0x1c   :  { %1960 = vmatprep.subr.bf16.mxu1 %v1959_v4  ;;  %v2063_v34 = vpack.c.bf16 %v1382_v33, %v1381_v32  ;;  %v2067_v38 = vpack.c.bf16 %v1384_v37, %v1383_v36  ;;  %v1328_v39 = vld [vmem:[%s2791_s3 + $0xe0] sm:$0xff]  ;;  %v1329_v40 = vld [vmem:[%s2791_s3 + $0xe8] sm:$0xff]  ;;  %v1330_v45 = vld [vmem:[%s2791_s3 + $0xf0] sm:$0xff]  ;;  %p2194_p4 = pnand %p2193_p3, %p2187_p0 }
  0x1d   :  { %1946 = vmatpush3.bf16.msra.mxu0 %v1943_v56  ;;  %v1385_v41 = vld [vmem:[%s2791_s3 + $0x260] sm:$0xff]  ;;  %v1975_v42 = vpack.c.bf16 %v1329_v40, %v1328_v39  ;;  %v1386_v43 = vld [vmem:[%s2791_s3 + $0x268] sm:$0xff]  ;;  %v1331_v46 = vld [vmem:[%s2791_s3 + $0xf8] sm:$0xff] }
  0x1e   :  { %1948 = vmatprep.subr.bf16.mxu0 %v1947_v1  ;;  %v2071_v44 = vpack.c.bf16 %v1386_v43, %v1385_v41  ;;  %v1387_v47 = vld [vmem:[%s2791_s3 + $0x270] sm:$0xff]  ;;  %v1979_v48 = vpack.c.bf16 %v1331_v46, %v1330_v45  ;;  %v1388_v49 = vld [vmem:[%s2791_s3 + $0x278] sm:$0xff]  ;;  %v432_v51 = vld [vmem:[%s2791_s3] sm:$0xff] }
  0x1f   :  { %1962 = vmatpush3.bf16.msra.mxu1 %v1959_v4  ;;  %v2075_v50 = vpack.c.bf16 %v1388_v49, %v1387_v47  ;;  %v433_v52 = vld [vmem:[%s2791_s3 + $0x8] sm:$0xff]  ;;  %v1357_v53 = vld [vmem:[%s2791_s3 + $0x180] sm:$0xff]  ;;  %v434_v4 = vld [vmem:[%s2791_s3 + $0x10] sm:$0xff] }
  0x20   :  { %1964 = vmatprep.subr.bf16.mxu1 %v1963_v15  ;;  %v1983_v54 = vpack.c.bf16 %v433_v52, %v432_v51  ;;  %v1358_v55 = vld [vmem:[%s2791_s3 + $0x188] sm:$0xff]  ;;  %v1315_v61 = vld [vmem:[%s2790_s2] ss:$0 sm:$0xff]  ;;  %v435_v5 = vld [vmem:[%s2791_s3 + $0x18] sm:$0xff] }
  0x21   :  { %1950 = vmatpush3.bf16.msra.mxu0 %v1947_v1  ;;  %v2079_v56 = vpack.c.bf16 %v1358_v55, %v1357_v53  ;;  %v1359_v8 = vld [vmem:[%s2791_s3 + $0x190] sm:$0xff]  ;;  %v436_v24 = vld [vmem:[%s2791_s3 + $0x20] sm:$0xff]  ;;  %v1362_v29 = vld [vmem:[%s2791_s3 + $0x1a8] sm:$0xff] }
  0x22   :  { %2048 = vmatprep.subr.bf16.mxu0 %v2047_v11  ;;  %v1361_v28 = vld [vmem:[%s2791_s3 + $0x1a0] sm:$0xff]  ;;  %vm2549_vm7 = vmneg %vm30_vm1  ;;  %v438_v36 = vld [vmem:[%s2791_s3 + $0x30] sm:$0xff] }
  0x23   :  { %1966 = vmatpush3.bf16.msra.mxu1 %v1963_v15  ;;  %v2087_v40 = vpack.c.bf16 %v1362_v29, %v1361_v28  ;;  %v439_v41 = vld [vmem:[%s2791_s3 + $0x38] sm:$0xff]  ;;  %v440_v52 = vld [vmem:[%s2791_s3 + $0x40] sm:$0xff]  ;;  %vm1350_vm8 = vmneg %vm40_vm3 }
  0x24   :  { %1648 = vmatmul.mubr.msk.f32.vlgmr.msra.gmra.mrb[0].mxu0 %vm102_vm0, %v315_v17  ;;  %1968 = vmatprep.subr.bf16.mxu1 %v1967_v23  ;;  %v1987_v17 = vpack.c.bf16 %v435_v5, %v434_v4  ;;  %v1364_v43 = vld [vmem:[%s2791_s3 + $0x1b8] sm:$0xff]  ;;  %v1365_v55 = vld [vmem:[%s2791_s3 + $0x1c0] sm:$0xff]  ;;  %v1370_v4 = vld [vmem:[%s2791_s3 + $0x1e8] sm:$0xff] }
  0x25   :  { %1650 = vmatprep.mubr.msk.f32.mxu0 %vm102_vm0, %v302_v18  ;;  %2050 = vmatpush3.bf16.msra.mxu0 %v2047_v11  ;;  %v1360_v11 = vld [vmem:[%s2791_s3 + $0x198] sm:$0xff]  ;;  %v1337_v28 = vld [vmem:[%s2791_s3 + $0x128] sm:$0xff]  ;;  %v1393_v29 = vld [vmem:[%s2791_s3 + $0x2a0] sm:$0xff] }
  0x26   :  { %2052 = vmatprep.subr.bf16.mxu0 %v2051_v20  ;;  %v2083_v19 = vpack.c.bf16 %v1360_v11, %v1359_v8  ;;  %v447_v8 = vld [vmem:[%s2791_s3 + $0x78] sm:$0xff]  ;;  %v1371_v11 = vld [vmem:[%s2791_s3 + $0x1f0] sm:$0xff]  ;;  %v1394_v35 = vld [vmem:[%s2791_s3 + $0x2a8] sm:$0xff] }
  0x27   :  { %1970 = vmatpush3.bf16.msra.mxu1 %v1967_v23  ;;  %v1338_v33 = vld [vmem:[%s2791_s3 + $0x130] sm:$0xff]  ;;  %vm1352_vm9 = vmneg %vm35_vm5  ;;  %v1099_v63 = vld [vmem:[%s2792_s4] sm:$0xff] }
  0x28   :  { %1651 = vmatmul.mubr.msk.f32.gmra.mrb[2].mxu0 %vm102_vm0, %v317_v26  ;;  %1972 = vmatprep.subr.bf16.mxu1 %v1971_v30  ;;  %vm1354_vm10 = vmneg %vm49_vm6 }
  0x29   :  { %2054 = vmatpush3.bf16.msra.mxu0 %v2051_v20 }
  0x2a   :  { %2056 = vmatprep.subr.bf16.mxu0 %v2055_v27 }
  0x2b   :  { %1974 = vmatpush3.bf16.msra.mxu1 %v1971_v30 }
  0x2c   :  { %1976 = vmatprep.subr.bf16.mxu1 %v1975_v42 }
  0x2d   :  { %2058 = vmatpush3.bf16.msra.mxu0 %v2055_v27  ;;  %v437_v27 = vld [vmem:[%s2791_s3 + $0x28] sm:$0xff] }
  0x2e   :  { %2060 = vmatprep.subr.bf16.mxu0 %v2059_v31  ;;  %v1991_v39 = vpack.c.bf16 %v437_v27, %v436_v24  ;;  %v1392_v24 = vld [vmem:[%s2791_s3 + $0x298] sm:$0xff]  ;;  %v1336_v27 = vld [vmem:[%s2791_s3 + $0x120] sm:$0xff] }
  0x2f   :  { %1978 = vmatpush3.bf16.msra.mxu1 %v1975_v42  ;;  %v1363_v42 = vld [vmem:[%s2791_s3 + $0x1b0] sm:$0xff] }
  0x30   :  { %1980 = vmatprep.subr.bf16.mxu1 %v1979_v48  ;;  %v2091_v51 = vpack.c.bf16 %v1364_v43, %v1363_v42  ;;  %v1397_v42 = vld [vmem:[%s2791_s3 + $0x2c0] sm:$0xff] }
  0x31   :  { %2062 = vmatpush3.bf16.msra.mxu0 %v2059_v31 }
  0x32   :  { %2064 = vmatprep.subr.bf16.mxu0 %v2063_v34 }
  0x33   :  { %1982 = vmatpush3.bf16.msra.mxu1 %v1979_v48 }
  0x34   :  { %1984 = vmatprep.subr.bf16.mxu1 %v1983_v54 }
  0x35   :  { %2066 = vmatpush3.bf16.msra.mxu0 %v2063_v34 }
  0x36   :  { %2068 = vmatprep.subr.bf16.mxu0 %v2067_v38 }
  0x39   :  { %2070 = vmatpush3.bf16.msra.mxu0 %v2067_v38 }
  0x3a   :  { %2072 = vmatprep.subr.bf16.mxu0 %v2071_v44 }
  0x3d   :  { %2074 = vmatpush3.bf16.msra.mxu0 %v2071_v44 }
  0x3e   :  { %2076 = vmatprep.subr.bf16.mxu0 %v2075_v50 }
  0x41   :  { %2078 = vmatpush3.bf16.msra.mxu0 %v2075_v50  ;;  %v1995_v50 = vpack.c.bf16 %v439_v41, %v438_v36  ;;  %v1395_v36 = vld [vmem:[%s2791_s3 + $0x2b0] sm:$0xff]  ;;  %v1341_v41 = vld [vmem:[%s2791_s3 + $0x148] sm:$0xff] }
  0x42   :  { %2080 = vmatprep.subr.bf16.mxu0 %v2079_v56 }
  0xe9   :  { %v1605_v57 = vpop.f32.mrb[0].mxu1 }
  0xea   :  { %v181_v58 = vpop.f32.mrb[1].mxu1 }
  0xed   :  { %v1608_v59 = vpop.f32.mrb[2].mxu1 }
  0xee   :  { %v191_v60 = vpop.f32.mrb[3].mxu1 }
  0xf7   :  { %v1649_v62 = vpop.f32.mrb[0].mxu0 }
  0xf8   :  { %v2159_v0 = vadd.f32 %v1649_v62, %v1605_v57  ;;  %v396_v1 = vpop.f32.mrb[1].mxu0 }
  0xf9   :  { %v2160_v2 = vadd.f32 %v396_v1, %v181_v58  ;;  %v442_v58 = vld [vmem:[%s2791_s3 + $0x50] sm:$0xff]  ;;  %v444_v1 = vld [vmem:[%s2791_s3 + $0x60] sm:$0xff] }
  0xfa   :  { %v424_v3 = vadd.f32 %v2159_v0, %v1315_v61 }
  0xfb   :  { %v423_v6 = vadd.f32 %v2160_v2, %v1315_v61  ;;  %v1652_v7 = vpop.f32.mrb[2].mxu0  ;;  %v445_v2 = vld [vmem:[%s2791_s3 + $0x68] sm:$0xff] }
  0xfc   :  { %v428_v12 = vmax.f32 %v424_v3, 0.0  ;;  %v2161_v14 = vadd.f32 %v1652_v7, %v1608_v59  ;;  %v406_v15 = vpop.f32.mrb[3].mxu0  ;;  %v443_v59 = vld [vmem:[%s2791_s3 + $0x58] sm:$0xff]  ;;  %v1369_v3 = vld [vmem:[%s2791_s3 + $0x1e0] sm:$0xff]  ;;  %v2007_v5 = vpack.c.bf16 %v445_v2, %v444_v1  ;;  %v446_v7 = vld [vmem:[%s2791_s3 + $0x70] sm:$0xff] }
  0xfd   :  { %v427_v16 = vmax.f32 %v423_v6, 0.0  ;;  %v2162_v13 = vadd.f32 %v406_v15, %v191_v60  ;;  %v1367_v60 = vld [vmem:[%s2791_s3 + $0x1d0] sm:$0xff]  ;;  %v2003_v62 = vpack.c.bf16 %v443_v59, %v442_v58  ;;  %v2103_v6 = vpack.c.bf16 %v1370_v4, %v1369_v3 }
  0xfe   :  { %v426_v18 = vadd.f32 %v2161_v14, %v1315_v61  ;;  %v483_v20 = vrot.slane %v428_v12, 7  ;;  %v665_v21 = vrot.slane %v428_v12, 1  ;;  %v2011_v14 = vpack.c.bf16 %v447_v8, %v446_v7  ;;  %v1346_v59 = vld [vmem:[%s2791_s3 + $0x170] sm:$0xff] }
  0xff   :  { %v425_v22 = vadd.f32 %v2162_v13, %v1315_v61  ;;  %1685 = vmatprep.mubr.f32.mxu1 %v427_v16  ;;  %1799 = vmatprep.mubr.f32.mxu0 %v427_v16  ;;  %v482_v23 = vrot.slane %v427_v16, 7  ;;  %v664_v25 = vrot.slane %v427_v16, 1  ;;  %v1368_v61 = vld [vmem:[%s2791_s3 + $0x1d8] sm:$0xff]  ;;  %v1332_v16 = vld [vmem:[%s2791_s3 + $0x100] sm:$0xff]  ;;  %v1333_v13 = vld [vmem:[%s2791_s3 + $0x108] sm:$0xff] }
 0x100   :  { %v430_v26 = vmax.f32 %v426_v18, 0.0  ;;  %1686 = vmatmul.mubr.f32.vlgmr.msra.gmra.mrb[4].mxu1 %v428_v12  ;;  %1800 = vmatmul.mubr.f32.vlgmr.msra.gmra.mrb[4].mxu0 %v428_v12  ;;  %v2099_v0 = vpack.c.bf16 %v1368_v61, %v1367_v60  ;;  %v1372_v12 = vld [vmem:[%s2791_s3 + $0x1f8] sm:$0xff]  ;;  %v1390_v18 = vld [vmem:[%s2791_s3 + $0x288] sm:$0xff]  ;;  %v1403_v61 = vld [vmem:[%s2791_s3 + $0x2f0] sm:$0xff] }
 0x101   :  { %v429_v30 = vmax.f32 %v425_v22, 0.0  ;;  %1986 = vmatpush3.bf16.msra.mxu1 %v1983_v54  ;;  %2082 = vmatpush3.bf16.msra.mxu0 %v2079_v56  ;;  %v2541_v31 = vsel %vm85_vm2, %v482_v23, %v483_v20  ;;  %v2545_v32 = vsel %vm301_vm4, %v664_v25, %v665_v21  ;;  %v441_v54 = vld [vmem:[%s2791_s3 + $0x48] sm:$0xff]  ;;  %v2107_v15 = vpack.c.bf16 %v1372_v12, %v1371_v11  ;;  %v1335_v22 = vld [vmem:[%s2791_s3 + $0x118] sm:$0xff] }
 0x102   :  { %1988 = vmatprep.subr.bf16.mxu1 %v1987_v17  ;;  %2084 = vmatprep.subr.bf16.mxu0 %v2083_v19  ;;  %v485_v34 = vrot.slane %v430_v26, 7  ;;  %v667_v37 = vrot.slane %v430_v26, 1  ;;  %v1366_v56 = vld [vmem:[%s2791_s3 + $0x1c8] sm:$0xff]  ;;  %v1999_v10 = vpack.c.bf16 %v441_v54, %v440_v52  ;;  %v1344_v54 = vld [vmem:[%s2791_s3 + $0x160] sm:$0xff]  ;;  %v1347_v60 = vld [vmem:[%s2791_s3 + $0x178] sm:$0xff] }
 0x103   :  { %v666_v38 = vrot.slane %v429_v30, 1  ;;  %1688 = vmatprep.mubr.f32.mxu1 %v429_v30  ;;  %1802 = vmatprep.mubr.f32.mxu0 %v429_v30  ;;  %v484_v44 = vrot.slane %v429_v30, 7  ;;  %v2095_v57 = vpack.c.bf16 %v1366_v56, %v1365_v55  ;;  %v2023_v30 = vpack.c.bf16 %v1337_v28, %v1336_v27  ;;  %v1345_v55 = vld [vmem:[%s2791_s3 + $0x168] sm:$0xff]  ;;  %v1401_v56 = vld [vmem:[%s2791_s3 + $0x2e0] sm:$0xff] }
 0x104   :  { %1689 = vmatmul.mubr.f32.gmra.mrb[6].mxu1 %v430_v26  ;;  %1803 = vmatmul.mubr.f32.gmra.mrb[6].mxu0 %v430_v26  ;;  %v489_v45 = vsel %vm85_vm2, %v485_v34, %v482_v23  ;;  %v2569_v46 = vsel %vm301_vm4, %v667_v37, %v664_v25  ;;  %v1391_v23 = vld [vmem:[%s2791_s3 + $0x290] sm:$0xff] }
 0x105   :  { %1990 = vmatpush3.bf16.msra.mxu1 %v1987_v17  ;;  %2086 = vmatpush3.bf16.msra.mxu0 %v2083_v19  ;;  %v2573_v47 = vsel %vm85_vm2, %v483_v20, %v484_v44  ;;  %v2577_v48 = vsel %vm85_vm2, %v484_v44, %v485_v34  ;;  %v2581_v49 = vsel %vm301_vm4, %v665_v21, %v666_v38  ;;  %v1389_v17 = vld [vmem:[%s2791_s3 + $0x280] sm:$0xff]  ;;  %v1334_v21 = vld [vmem:[%s2791_s3 + $0x110] sm:$0xff]  ;;  %v1339_v34 = vld [vmem:[%s2791_s3 + $0x138] sm:$0xff] }
 0x106   :  { %1723 = vmatprep.mubr.msk.f32.mxu1 %vm2549_vm7, %v489_v45  ;;  %1837 = vmatprep.mubr.msk.f32.mxu0 %vm2549_vm7, %v489_v45  ;;  %v2592_v53 = vsel %vm301_vm4, %v666_v38, %v667_v37  ;;  %v2015_v19 = vpack.c.bf16 %v1333_v13, %v1332_v16  ;;  %v2111_v20 = vpack.c.bf16 %v1390_v18, %v1389_v17  ;;  %v1396_v37 = vld [vmem:[%s2791_s3 + $0x2b8] sm:$0xff]  ;;  %v1342_v45 = vld [vmem:[%s2791_s3 + $0x150] sm:$0xff] }
 0x107   :  { %1992 = vmatprep.subr.bf16.mxu1 %v1991_v39  ;;  %2088 = vmatprep.subr.bf16.mxu0 %v2087_v40  ;;  %v2019_v25 = vpack.c.bf16 %v1335_v22, %v1334_v21  ;;  %v2115_v26 = vpack.c.bf16 %v1392_v24, %v1391_v23  ;;  %v2027_v38 = vpack.c.bf16 %v1339_v34, %v1338_v33  ;;  %v1416_v33 = vld [vmem:[%s2792_s4 + $0x18] sm:$0xff] }
 0x109   :  { %1994 = vmatpush3.bf16.msra.mxu1 %v1991_v39  ;;  %2090 = vmatpush3.bf16.msra.mxu0 %v2087_v40  ;;  %v2123_v39 = vpack.c.bf16 %v1396_v37, %v1395_v36  ;;  %v1340_v40 = vld [vmem:[%s2791_s3 + $0x140] sm:$0xff] }
 0x10a   :  { %1996 = vmatprep.subr.bf16.mxu1 %v1995_v50  ;;  %2092 = vmatprep.subr.bf16.mxu0 %v2091_v51  ;;  %v2031_v43 = vpack.c.bf16 %v1341_v41, %v1340_v40 }
 0x10d   :  { %1998 = vmatpush3.bf16.msra.mxu1 %v1995_v50  ;;  %2094 = vmatpush3.bf16.msra.mxu0 %v2091_v51  ;;  %v1400_v50 = vld [vmem:[%s2791_s3 + $0x2d8] sm:$0xff] }
 0x10e   :  { %2000 = vmatprep.subr.bf16.mxu1 %v1999_v10  ;;  %2096 = vmatprep.subr.bf16.mxu0 %v2095_v57 }
 0x111   :  { %2002 = vmatpush3.bf16.msra.mxu1 %v1999_v10  ;;  %2098 = vmatpush3.bf16.msra.mxu0 %v2095_v57  ;;  %v1402_v10 = vld [vmem:[%s2791_s3 + $0x2e8] sm:$0xff]  ;;  %v2039_v57 = vpack.c.bf16 %v1345_v55, %v1344_v54 }
 0x112   :  { %2004 = vmatprep.subr.bf16.mxu1 %v2003_v62  ;;  %2100 = vmatprep.subr.bf16.mxu0 %v2099_v0  ;;  %v2135_v58 = vpack.c.bf16 %v1402_v10, %v1401_v56 }
 0x115   :  { %2006 = vmatpush3.bf16.msra.mxu1 %v2003_v62  ;;  %2102 = vmatpush3.bf16.msra.mxu0 %v2099_v0  ;;  %v1404_v62 = vld [vmem:[%s2791_s3 + $0x2f8] sm:$0xff]  ;;  %v2043_v0 = vpack.c.bf16 %v1347_v60, %v1346_v59 }
 0x116   :  { %2008 = vmatprep.subr.bf16.mxu1 %v2007_v5  ;;  %2104 = vmatprep.subr.bf16.mxu0 %v2103_v6  ;;  %v2139_v1 = vpack.c.bf16 %v1404_v62, %v1403_v61 }
 0x119   :  { %2010 = vmatpush3.bf16.msra.mxu1 %v2007_v5  ;;  %2106 = vmatpush3.bf16.msra.mxu0 %v2103_v6 }
 0x11a   :  { %2012 = vmatprep.subr.bf16.mxu1 %v2011_v14  ;;  %2108 = vmatprep.subr.bf16.mxu0 %v2107_v15 }
 0x11d   :  { %2014 = vmatpush3.bf16.msra.mxu1 %v2011_v14  ;;  %2110 = vmatpush3.bf16.msra.mxu0 %v2107_v15 }
 0x11e   :  { %2016 = vmatprep.subr.bf16.mxu1 %v2015_v19  ;;  %2112 = vmatprep.subr.bf16.mxu0 %v2111_v20 }
 0x120   :  { %1724 = vmatmul.mubr.f32.vlgmr.msra.gmra.mrb[4].mxu1 %v2541_v31  ;;  %1838 = vmatmul.mubr.f32.vlgmr.msra.gmra.mrb[4].mxu0 %v2541_v31  ;;  %v2119_v31 = vpack.c.bf16 %v1394_v35, %v1393_v29 }
 0x121   :  { %1726 = vmatprep.mubr.msk.f32.mxu1 %vm1350_vm8, %v2573_v47  ;;  %2018 = vmatpush3.bf16.msra.mxu1 %v2015_v19 }
 0x122   :  { %1840 = vmatprep.mubr.msk.f32.mxu0 %vm1350_vm8, %v2573_v47  ;;  %2114 = vmatpush3.bf16.msra.mxu0 %v2111_v20  ;;  %v1343_v47 = vld [vmem:[%s2791_s3 + $0x158] sm:$0xff] }
 0x123   :  { %2020 = vmatprep.subr.bf16.mxu1 %v2019_v25  ;;  %2116 = vmatprep.subr.bf16.mxu0 %v2115_v26  ;;  %v2035_v51 = vpack.c.bf16 %v1343_v47, %v1342_v45 }
 0x124   :  { %1727 = vmatmul.mubr.f32.gmra.mrb[6].mxu1 %v2577_v48  ;;  %1841 = vmatmul.mubr.f32.gmra.mrb[6].mxu0 %v2577_v48  ;;  %v1399_v48 = vld [vmem:[%s2791_s3 + $0x2d0] sm:$0xff] }
 0x125   :  { %2022 = vmatpush3.bf16.msra.mxu1 %v2019_v25  ;;  %1761 = vmatprep.mubr.f32.mxu1 %v2545_v32  ;;  %v2131_v52 = vpack.c.bf16 %v1400_v50, %v1399_v48 }
 0x126   :  { %2118 = vmatpush3.bf16.msra.mxu0 %v2115_v26  ;;  %1875 = vmatprep.mubr.f32.mxu0 %v2545_v32  ;;  %v1398_v32 = vld [vmem:[%s2791_s3 + $0x2c8] sm:$0xff] }
 0x127   :  { %2024 = vmatprep.subr.bf16.mxu1 %v2023_v30  ;;  %2120 = vmatprep.subr.bf16.mxu0 %v2119_v31  ;;  %v2127_v44 = vpack.c.bf16 %v1398_v32, %v1397_v42 }
 0x129   :  { %2026 = vmatpush3.bf16.msra.mxu1 %v2023_v30  ;;  %v1100_v30 = vld [vmem:[%s2792_s4 + $0x8] sm:$0xff] }
 0x12a   :  { %2122 = vmatpush3.bf16.msra.mxu0 %v2119_v31  ;;  %2028 = vmatprep.subr.bf16.mxu1 %v2027_v38  ;;  %v1415_v31 = vld [vmem:[%s2792_s4 + $0x10] sm:$0xff] }
 0x12b   :  { %2124 = vmatprep.subr.bf16.mxu0 %v2123_v39 }
 0x12d   :  { %2030 = vmatpush3.bf16.msra.mxu1 %v2027_v38 }
 0x12e   :  { %2126 = vmatpush3.bf16.msra.mxu0 %v2123_v39  ;;  %2032 = vmatprep.subr.bf16.mxu1 %v2031_v43 }
 0x12f   :  { %2128 = vmatprep.subr.bf16.mxu0 %v2127_v44 }
 0x131   :  { %2034 = vmatpush3.bf16.msra.mxu1 %v2031_v43 }
 0x132   :  { %2130 = vmatpush3.bf16.msra.mxu0 %v2127_v44  ;;  %2036 = vmatprep.subr.bf16.mxu1 %v2035_v51 }
 0x133   :  { %2132 = vmatprep.subr.bf16.mxu0 %v2131_v52 }
 0x135   :  { %2038 = vmatpush3.bf16.msra.mxu1 %v2035_v51 }
 0x136   :  { %2134 = vmatpush3.bf16.msra.mxu0 %v2131_v52  ;;  %2040 = vmatprep.subr.bf16.mxu1 %v2039_v57 }
 0x137   :  { %2136 = vmatprep.subr.bf16.mxu0 %v2135_v58 }
 0x139   :  { %2042 = vmatpush3.bf16.msra.mxu1 %v2039_v57 }
 0x13a   :  { %2138 = vmatpush3.bf16.msra.mxu0 %v2135_v58  ;;  %2044 = vmatprep.subr.bf16.mxu1 %v2043_v0 }
 0x13b   :  { %2140 = vmatprep.subr.bf16.mxu0 %v2139_v1 }
 0x13d   :  { %2046 = vmatpush3.bf16.msra.mxu1 %v2043_v0 }
 0x13e   :  { %2142 = vmatpush3.bf16.msra.mxu0 %v2139_v1 }
 0x140   :  { %1762 = vmatmul.mubr.msk.f32.vlgmr.msra.gmra.mrb[4].mxu1 %vm1352_vm9, %v2581_v49 }
 0x141   :  { %1876 = vmatmul.mubr.msk.f32.vlgmr.msra.gmra.mrb[4].mxu0 %vm1352_vm9, %v2581_v49  ;;  %1764 = vmatprep.mubr.f32.mxu1 %v2592_v53  ;;  %v1356_v49 = vld [vmem:[%s2790_s2 + $0x1] ss:$0 sm:$0xff] }
 0x142   :  { %1878 = vmatprep.mubr.f32.mxu0 %v2592_v53 }
 0x144   :  { %1765 = vmatmul.mubr.msk.f32.gmra.mrb[6].mxu1 %vm1354_vm10, %v2569_v46 }
 0x145   :  { %1879 = vmatmul.mubr.msk.f32.gmra.mrb[6].mxu0 %vm1354_vm10, %v2569_v46  ;;  %1889 = vmatprep.mubr.msk.f32.mxu1 %vm1101_vm11, %v1099_v63 }
 0x213   :  { %v1763_v2 = vpop.f32.mrb[4].mxu1 }
 0x214   :  { %v770_v9 = vadd.f32 %v1763_v2, %v1356_v49  ;;  %v1877_v3 = vpop.f32.mrb[4].mxu0  ;;  %v742_v4 = vpop.f32.mrb[5].mxu1 }
 0x215   :  { %v1088_v53 = vadd.f32 %v1877_v3, %v1356_v49  ;;  %v769_v5 = vadd.f32 %v1356_v49, %v742_v4  ;;  %v1064_v6 = vpop.f32.mrb[5].mxu0 }
 0x216   :  { %v774_v7 = vmax.f32 %v770_v9, 0.0  ;;  %v1087_v46 = vadd.f32 %v1356_v49, %v1064_v6 }
 0x217   :  { %v1092_v8 = vmax.f32 %v1088_v53, 0.0  ;;  %v773_v11 = vmax.f32 %v769_v5, 0.0  ;;  %v1766_v12 = vpop.f32.mrb[6].mxu1 }
 0x218   :  { %v1091_v14 = vmax.f32 %v1087_v46, 0.0  ;;  %v772_v15 = vadd.f32 %v1766_v12, %v1356_v49  ;;  %v1880_v16 = vpop.f32.mrb[6].mxu0  ;;  %v752_v13 = vpop.f32.mrb[7].mxu1 }
 0x219   :  { %v1096_v17 = vmax.f32 %v774_v7, %v1092_v8  ;;  %v1090_v18 = vadd.f32 %v1880_v16, %v1356_v49  ;;  %v771_v19 = vadd.f32 %v1356_v49, %v752_v13  ;;  %v1074_v20 = vpop.f32.mrb[7].mxu0 }
 0x21a   :  { %v1095_v21 = vmax.f32 %v773_v11, %v1091_v14  ;;  %v776_v22 = vmax.f32 %v772_v15, 0.0  ;;  %v1089_v23 = vadd.f32 %v1356_v49, %v1074_v20 }
 0x21b   :  { %v1094_v24 = vmax.f32 %v1090_v18, 0.0  ;;  %v775_v25 = vmax.f32 %v771_v19, 0.0 }
 0x21c   :  { %v2143_v26 = vpack.c.bf16 %v1096_v17, %v1095_v21  ;;  %v1093_v27 = vmax.f32 %v1089_v23, 0.0 }
 0x21d   :  { %v1098_v28 = vmax.f32 %v776_v22, %v1094_v24 }
 0x21e   :  { %v1097_v29 = vmax.f32 %v775_v25, %v1093_v27  ;;  %2144 = vmatprep.subr.bf16.mxu1 %v2143_v26 }
 0x21f   :  { %2146 = vmatpush3.bf16.msra.mxu1 %v2143_v26 }
 0x220   :  { %v2147_v35 = vpack.c.bf16 %v1098_v28, %v1097_v29 }
 0x222   :  { %2148 = vmatprep.subr.bf16.mxu1 %v2147_v35 }
 0x223   :  { %2150 = vmatpush3.bf16.msra.mxu1 %v2147_v35 }
 0x224   :  { %2152 = vmatprep.subr.bf16.mxu1 %v2143_v26 }
 0x226   :  { %1890 = vmatmul.mubr.msk.f32.vlgmr.msra.gmra.mrb[8].mxu1 %vm1101_vm11, %v1100_v30 }
 0x227   :  { %2154 = vmatpush3.bf16.msra.mxu1 %v2143_v26  ;;  %1900 = vmatprep.mubr.msk.f32.mxu1 %vm1101_vm11, %v1415_v31 }
 0x228   :  { %2156 = vmatprep.subr.bf16.mxu1 %v2147_v35 }
 0x22b   :  { %2158 = vmatpush3.bf16.msra.mxu1 %v2147_v35 }
 0x22e   :  { %1901 = vmatmul.mubr.msk.f32.vlgmr.msra.gmra.mrb[10].mxu1 %vm1101_vm11, %v1416_v33 }
 0x2f9   :  { %v1891_v34 = vpop.f32.mrb[8].mxu1 }
 0x2fa   :  { %v1174_v36 = vpop.f32.mrb[9].mxu1 }
 0x301   :  { %v1902_v37 = vpop.f32.mrb[10].mxu1 }
 0x302   :  { %v1268_v38 = vmax.f32 %v1891_v34, %v1902_v37  ;;  %v1258_v39 = vpop.f32.mrb[11].mxu1 }
 0x303   :  { %v1267_v40 = vmax.f32 %v1174_v36, %v1258_v39 }
 0x304   :  { %1270 = vst.msk [vmem:[#allocation2 + $0x8] sm:$0xff] %vm102_vm0, %v1268_v38 }
 0x305   :  { %1269 = vst.msk [vmem:[#allocation2] sm:$0xff] %vm102_vm0, %v1267_v40 }
 0x306   :  { %2197 = shalt.err (!%p2194_p4)
}
 0x307   :  { %s2198_s13 = scalar_lea.hbm %s2793_s5, 256 }
 0x308   :  { %p2199_p5 = scmp.ne.s32.totalorder %s2793_s5, %s2198_s13  ;;  %p2202_p6 = scmp.lt.u32.totalorder %s2198_s13, %s2793_s5 }
 0x30a   :  { %p2204_p7 = pnand %p2202_p6, %p2199_p5 }
 0x30c   :  { %2207 = shalt.err (!%p2204_p7)
}
 0x30d   :  { %s2211_s18 = smov 128   ;;  %s2212_s19 = smov 8  }
 0x30e   :  { %1282 = dma.vmem_to_hbm [thread:$0]  %s1277_s11, 256, %s2793_s5, [#allocation3], %s2211_s18, %s2211_s18, %s2212_s19  }
 0x30f   :  { %2208 = dma.done.wait [#allocation3], 256  }
 0x310   :  { %2209 = vsyncadd [#allocation3], 4294967040 }
 0x311   :  { %1286 = vsyncpa [#allocation3], 1 }

</bundles_post_ra>
